<compile_context>
chip_gen: v6e
topology: v6e:2x2x1
jax: 0.10.0
libtpu: 0.0.40
codegen_flags: <defaults>
</compile_context>

<pallas_src>
import functools

import numpy as np
import jax
import jax.numpy as jnp
from jax.experimental import pallas as pl
from jax.experimental.pallas import tpu as pltpu


# ------------------------------- Pallas kernel -------------------------------


def _paired_softmax_kernel(x_ref, o_ref, *, cls_num):
    """x_ref / o_ref: (1, C, S_blk).  Softmax over channel pairs (2i, 2i+1)."""
    x = x_ref[0].astype(jnp.float32)                 # (C, S_blk)
    C, S = x.shape

    rows = []
    for i in range(cls_num):                         # static, unrolled
        x0 = x[2 * i:2 * i + 1, :]                   # (1, S_blk)
        x1 = x[2 * i + 1:2 * i + 2, :]               # (1, S_blk)
        m = jnp.maximum(x0, x1)                      # stable 2-way softmax
        e0 = jnp.exp(x0 - m)
        e1 = jnp.exp(x1 - m)
        inv = 1.0 / (e0 + e1)
        rows.append(e0 * inv)
        rows.append(e1 * inv)

    rem = C - 2 * cls_num
    if rem > 0:                                      # channels the PyTorch code
        rows.append(jnp.zeros((rem, S), jnp.float32))  # leaves at zero

    y = rows[0] if len(rows) == 1 else jnp.concatenate(rows, axis=0)
    o_ref[0] = y.astype(o_ref.dtype)                 # single lane-dense store


# ------------------------------- host wrapper --------------------------------


def _pick_spatial_block(S, max_block=1 << 15):
    """Largest multiple-of-128 divisor of S not above max_block (or S itself)."""
    if S <= max_block or S % 128 != 0:
        return S
    start = max_block - (max_block % 128)
    for cand in range(start, 0, -128):
        if S % cand == 0:
            return cand
    return S


def paired_softmax(x, cls_num):
    """x: (N, C, *spatial) channels-first.  Returns the same shape/dtype."""
    N, C = x.shape[0], x.shape[1]
    assert 2 * cls_num <= C, "cls_num pairs must fit in the channel dimension"
    spatial = x.shape[2:]
    S = int(np.prod(spatial)) if spatial else 1
    xf = x.reshape(N, C, S)                          # flatten spatial -> lanes

    blk = _pick_spatial_block(S)
    grid = (N, S // blk)

    cost = pl.CostEstimate(
        flops=6 * N * 2 * cls_num * S,
        transcendentals=2 * N * cls_num * S,
        bytes_accessed=2 * x.size * x.dtype.itemsize,
    )

    yf = pl.pallas_call(
        functools.partial(_paired_softmax_kernel, cls_num=cls_num),
        out_shape=jax.ShapeDtypeStruct((N, C, S), x.dtype),
        grid=grid,
        in_specs=[pl.BlockSpec((1, C, blk), lambda n, s: (n, 0, s))],
        out_specs=pl.BlockSpec((1, C, blk), lambda n, s: (n, 0, s)),
        compiler_params=pltpu.CompilerParams(
            dimension_semantics=("parallel", "parallel")),
        cost_estimate=cost,
    )(xf)
    return yf.reshape(x.shape)


# ---------------------------- plain-JAX reference ----------------------------


def ref_paired_softmax(x, cls_num):
    y = jnp.zeros_like(x)
    for i in range(cls_num):
        y = y.at[:, 2 * i:2 * i + 2].set(
            jax.nn.softmax(x[:, 2 * i:2 * i + 2], axis=1))
    return y


# ------------------------------------ main ------------------------------------


if __name__ == "__main__":
    key = jax.random.PRNGKey(0)
    k1, k2 = jax.random.split(key)

    # 4-D input (N, C, H, W) with cls_num = 2  (C = 2 * cls_num)
    x4 = 3.0 * jax.random.normal(k1, (2, 4, 16, 16), jnp.float32)
    y4 = jax.block_until_ready(paired_softmax(x4, cls_num=2))
    np.testing.assert_allclose(np.asarray(y4),
                               np.asarray(ref_paired_softmax(x4, 2)),
                               rtol=1e-5, atol=1e-6)

    # 5-D input (N, C, D, H, W) with cls_num = 4
    x5 = 3.0 * jax.random.normal(k2, (2, 8, 4, 8, 8), jnp.float32)
    y5 = jax.block_until_ready(paired_softmax(x5, cls_num=4))
    np.testing.assert_allclose(np.asarray(y5),
                               np.asarray(ref_paired_softmax(x5, 4)),
                               rtol=1e-5, atol=1e-6)

    print("KERNEL_OK")
</pallas_src>

<mosaic_0001>
module attributes {stable_mosaic.version = 11 : i64} {
  func.func @_paired_softmax_kernel(%arg0: i32, %arg1: i32, %arg2: memref<1x4x256xf32, #tpu.memory_space<vmem>>, %arg3: memref<1x4x256xf32, #tpu.memory_space<vmem>>) attributes {dimension_semantics = [#tpu.dimension_semantics<parallel>, #tpu.dimension_semantics<parallel>], iteration_bounds = array<i64: 2, 1>, scalar_prefetch = 0 : i64, scratch_operands = 0 : i64, tpu.core_type = #tpu.core_type<tc>, window_params = [{transform_indices = @transform_0, window_bounds = array<i64: 1, 4, 256>}, {transform_indices = @transform_1, window_bounds = array<i64: 1, 4, 256>}]} {
    %c0 = arith.constant 0 : index
    %c0_0 = arith.constant 0 : index
    %c0_1 = arith.constant 0 : index
    %0 = vector.load %arg2[%c0, %c0_0, %c0_1] : memref<1x4x256xf32, #tpu.memory_space<vmem>>, vector<1x4x256xf32>
    %1 = vector.shape_cast %0 : vector<1x4x256xf32> to vector<4x256xf32>
    %2 = vector.extract_strided_slice %1 {offsets = [0, 0], sizes = [1, 256], strides = [1, 1]} : vector<4x256xf32> to vector<1x256xf32>
    %3 = vector.extract_strided_slice %1 {offsets = [1, 0], sizes = [1, 256], strides = [1, 1]} : vector<4x256xf32> to vector<1x256xf32>
    %4 = arith.maximumf %2, %3 : vector<1x256xf32>
    %5 = arith.subf %2, %4 : vector<1x256xf32>
    %6 = math.exp %5 : vector<1x256xf32>
    %7 = arith.subf %3, %4 : vector<1x256xf32>
    %8 = math.exp %7 : vector<1x256xf32>
    %9 = arith.addf %6, %8 : vector<1x256xf32>
    %cst = arith.constant 1.000000e+00 : f32
    %10 = vector.broadcast %cst : f32 to vector<1x256xf32>
    %11 = arith.divf %10, %9 : vector<1x256xf32>
    %12 = arith.mulf %6, %11 : vector<1x256xf32>
    %13 = arith.mulf %8, %11 : vector<1x256xf32>
    %14 = vector.extract_strided_slice %1 {offsets = [2, 0], sizes = [1, 256], strides = [1, 1]} : vector<4x256xf32> to vector<1x256xf32>
    %15 = vector.extract_strided_slice %1 {offsets = [3, 0], sizes = [1, 256], strides = [1, 1]} : vector<4x256xf32> to vector<1x256xf32>
    %16 = arith.maximumf %14, %15 : vector<1x256xf32>
    %17 = arith.subf %14, %16 : vector<1x256xf32>
    %18 = math.exp %17 : vector<1x256xf32>
    %19 = arith.subf %15, %16 : vector<1x256xf32>
    %20 = math.exp %19 : vector<1x256xf32>
    %21 = arith.addf %18, %20 : vector<1x256xf32>
    %cst_2 = arith.constant 1.000000e+00 : f32
    %22 = vector.broadcast %cst_2 : f32 to vector<1x256xf32>
    %23 = arith.divf %22, %21 : vector<1x256xf32>
    %24 = arith.mulf %18, %23 : vector<1x256xf32>
    %25 = arith.mulf %20, %23 : vector<1x256xf32>
    %26 = tpu.concatenate %12, %13, %24, %25 in 0 : vector<1x256xf32>, vector<1x256xf32>, vector<1x256xf32>, vector<1x256xf32> -> vector<4x256xf32>
    %c0_3 = arith.constant 0 : index
    %c0_4 = arith.constant 0 : index
    %c0_5 = arith.constant 0 : index
    %27 = vector.load %arg3[%c0_3, %c0_4, %c0_5] : memref<1x4x256xf32, #tpu.memory_space<vmem>>, vector<1x4x256xf32>
    %28 = vector.shape_cast %27 : vector<1x4x256xf32> to vector<4x256xf32>
    %29 = vector.shape_cast %26 : vector<4x256xf32> to vector<1x4x256xf32>
    tpu.vector_store %arg3[%c0_3, %c0_4, %c0_5], %29 {strides = array<i32>} : memref<1x4x256xf32, #tpu.memory_space<vmem>>, vector<1x4x256xf32>,
    return
  }
  func.func @transform_0(%arg0: i32, %arg1: i32) -> (i32, i32, i32) {
    %c0_i32 = arith.constant 0 : i32
    %c0_i32_0 = arith.constant 0 : i32
    return %arg0, %c0_i32, %arg1 : i32, i32, i32
  }
  func.func @transform_1(%arg0: i32, %arg1: i32) -> (i32, i32, i32) {
    %c0_i32 = arith.constant 0 : i32
    %c0_i32_0 = arith.constant 0 : i32
    return %arg0, %c0_i32, %arg1 : i32, i32, i32
  }
}

</mosaic_0001>

<bundles_post_ra>
// kernel: tpu_custom_call.1
= control target key start
LH: loop header
LB: loop body
LE: loop exit
PB: predicated region body
PF: predicated region fallthrough
CT: control target
= control target key end

     0   :  { %6 = vsyncpa [#allocation3], 0  ;;  %s684_s0 = inlined_call_operand.hbm [shape: f32[2,4,256], index: 0, kind: input, shape index: {}]   ;;  %s685_s1 = inlined_call_operand.hbm [shape: f32[2,4,256], index: 1, kind: output, shape index: {}]  }
   0x1   :  { %8 = vsyncpa [#allocation3 + $0x1], 0 }
   0x2   :  { %9 = vsyncpa [#allocation4], 0 }
   0x3   :  { %11 = vsyncpa [#allocation4 + $0x1], 0  ;;  %s546_s6 = smov 0   ;;  %s548_s7 = smov 0  }
   0x4   :  { %s550_s8 = smov 0   ;;  %s552_s9 = smov 0  }
   0x5   :  { %s554_s10 = smov 0   ;;  %s556_s11 = smov 0  }
   0x6 LB: > { %s337_s12 = sadd.s32 4294967295, %s532_s11   ;;  %s338_s13 = sadd.s32 4294967294, %s532_s11   ;;  %s532_s11 = sphi %s556_s11, %s17_s11   ;;  %s528_s10 = sphi %s554_s10, %s697_s10   ;;  %s524_s9 = sphi %s552_s9, %s696_s9   ;;  %s520_s8 = sphi %s550_s8, %s695_s8   ;;  %s516_s7 = sphi %s548_s7, %s694_s7   ;;  %s512_s6 = sphi %s546_s6, %s693_s6  }
   0x7   : > { %s29_s14 = sadd.s32 1, %s528_s10  ;;  %s38_s15 = sadd.s32 1, %s520_s8 }
   0x8   : > { %p31_p0 = scmp.ge.s32.totalorder %s29_s14, 2  ;;  %p45_p1 = scmp.ne.s32.totalorder %s520_s8, %s516_s7 }
   0x9   : > { %p46_p2 = scmp.eq.s32.totalorder %s532_s11, 0  ;;  %p51_p3 = scmp.ne.s32.totalorder %s516_s7, %s512_s6 }
   0xa   : > { %s699_s14 = smov (%p31_p0, %s29_s14), 0  ;;  %p52_p5 = scmp.eq.s32.totalorder %s337_s12, 0 }
   0xb   : > { %p587_p4 = por %p46_p2, %p45_p1  ;;  %s33_s17 = ssub.s32 %s528_s10, %s699_s14 }
   0xc   : > { %p77_p6 = scmp.eq.s32.totalorder %s337_s12, 1  ;;  %p36_p7 = scmp.eq.s32.totalorder %s33_s17, 0 }
   0xd   : > { %p593_p8 = por %p52_p5, %p51_p3  ;;  %p83_p10 = scmp.eq.s32.totalorder %s338_s13, 1 }
   0xe   : > { %p597_p9 = por %p77_p6, %p45_p1  ;;  %p368_p13 = scmp.lt.s32.totalorder %s532_s11, 2 }
   0xf   : > { %s602_s20 = scalar_select %p36_p7, %s520_s8, %s38_s15  }
  0x10   : > { %p604_p11 = por %p83_p10, %p51_p3  ;;  %s103_s22 = sand.u32 1, %s520_s8  }
  0x11   : > { %s341_s23 = sshll.u32 %s103_s22, 3  ;;  %s354_s24 = sshll.u32 %s528_s10, 7 }
  0x12   : > { %s689_s21 = scalar_select %p604_p11, 1, 0 }
  0x13   : > { %s115_s27 = scalar_lea.hbm %s684_s0, %s354_s24  ;;  %s107_s28 = scalar_lea.vmem [#allocation2], %s341_s23 }
  0x14   : > { %s117_s29 = sshll.u32 %s107_s28, 4  ;;  %p617_p0 = pnand %p368_p13, %p587_p4  ;;  %s118_s29 = int_to_ptr.vmem [resolvable:$true] %s117_s29 }
  0x15   : > { %p344_p1 = scmp.ge.s32.totalorder %s532_s11, 1  ;;  %p122_p2 = scmp.lt.s32.totalorder %s532_s11, 3 }
  0x16   : > { %s104_s2 = scalar_lea.sflag [#allocation3], %s103_s22  ;;  %p426_p3 = pneg %p617_p0 }
  0x17   : > { %s437_s3 = scalar_lea.vmem %s118_s29, 128  ;;  %s534_s4 = smov [#allocation2]  }
  0x18   : > { %p438_p5 = scmp.ne.s32.totalorder %s118_s29, %s437_s3  ;;  %s442_s5 = sshll.u32 %s534_s4, 4  ;;  %s443_s5 = int_to_ptr.vmem [resolvable:$false] %s442_s5 }
  0x19   : > { %s444_s12 = scalar_lea.vmem %s443_s5, 256  ;;  %p445_p10 = scmp.lt.s32.totalorder %s118_s29, %s443_s5 }
  0x1a   : > { %p440_p6 = pnand %p438_p5, %p426_p3  ;;  %p446_p12 = scmp.lt.s32.totalorder %s444_s12, %s437_s3 }
  0x1c   : > { %p441_p7 = pneg %p440_p6  ;;  %p447_p4 = por %p446_p12, %p445_p10 }
  0x1e   : > { %p448_p13 = pnand %p447_p4, %p441_p7 }
  0x20   : > { %451 = shalt.err (!%p448_p13)
}
  0x21   : > { %363 = dma.hbm_to_vmem [thread:$0]  (!%p617_p0), %s115_s27, 128, %s118_s29, %s104_s2  }
  0x22   : > { %p123_p11 = pnand %p344_p1, %p122_p2 }
  0x23   : > { %s632_s13 = sand.u32 (!%p123_p11), 1, %s516_s7  }
  0x24   : > { %126 = sbr.rel (%p123_p11) target bundleno = 109 (0x6d), region = 24  ;;  %s345_s15 = sshll.u32 (!%p123_p11), %s632_s13, 3 }
  0x25   : > { %s129_s16 = scalar_lea.sflag (!%p123_p11), [#allocation3], %s632_s13  ;;  %s132_s17 = scalar_lea.vmem (!%p123_p11), [#allocation2], %s345_s15 }
  0x29   : > { %503 = dma.done.wait (%p593_p8), %s129_s16, 128  }
  0x2a   : > { %505 = vsyncadd (%p593_p8), %s129_s16, 4294967168  ;;  %v153_v0 = vld [vmem:[%s132_s17] sm:$0xff]  ;;  %v181_v12 = vlaneseq  ;;  %vm222_vm0 = vcmask 1040384   ;;  %vm225_vm1 = vcmask 1041408   ;;  %vm228_vm2 = vcmask 1042432   ;;  %s150_s18 = scalar_lea.vmem [#allocation5], %s345_s15 }
  0x2b   : > { %v347_v1 = vrot.slane %v153_v0, 9  ;;  %s253_s22 = sshll.u32 %s150_s18, 4  ;;  %s355_s23 = sshll.u32 %s524_s9, 7  ;;  %s254_s22 = int_to_ptr.vmem [resolvable:$true] %s253_s22 }
  0x2c   : > { %v182_v13 = vshrl.u32 %v181_v12, 7  ;;  %s251_s26 = scalar_lea.hbm %s685_s1, %s355_s23  ;;  %s237_s27 = scalar_lea.sflag [#allocation4], %s632_s13 }
  0x2d   : > { %v158_v2 = vmax.f32 %v153_v0, %v347_v1  ;;  %s452_s28 = scalar_lea.vmem %s254_s22, 128  ;;  %s535_s29 = smov [#allocation5]  }
  0x2e   : > { %v183_v14 = vsub.s32 0, %v182_v13  ;;  %v187_v15 = vsub.s32 4, %v182_v13  ;;  %v194_v17 = vsub.s32 1, %v182_v13  ;;  %v198_v18 = vsub.s32 5, %v182_v13  ;;  %p453_p8 = scmp.ne.s32.totalorder %s254_s22, %s452_s28  ;;  %s456_s30 = sshll.u32 %s535_s29, 4  ;;  %s457_s30 = int_to_ptr.vmem [resolvable:$false] %s456_s30 }
  0x2f   : > { %v159_v3 = vsub.f32 %v153_v0, %v158_v2  ;;  %v163_v4 = vrot.slane %v158_v2, 7  ;;  %v204_v19 = vsub.s32 2, %v182_v13  ;;  %v208_v20 = vsub.s32 6, %v182_v13  ;;  %s458_s9 = scalar_lea.vmem %s457_s30, 256  ;;  %p459_p0 = scmp.lt.s32.totalorder %s254_s22, %s457_s30 }
  0x30   : > { %v214_v23 = vsub.s32 3, %v182_v13  ;;  %v218_v24 = vsub.s32 7, %v182_v13  ;;  %p454_p11 = pnand %p453_p8, %p597_p9  ;;  %p460_p1 = scmp.lt.s32.totalorder %s458_s9, %s452_s28 }
  0x31   : > { %v160_v5 = vmul.f32 1.442695, %v159_v3  ;;  %v165_v6 = vsub.f32 %v153_v0, %v163_v4 }
  0x32   : > { %p455_p12 = pneg %p454_p11  ;;  %p461_p2 = por %p460_p1, %p459_p0 }
  0x33   : > { %v166_v7 = vmul.f32 1.442695, %v165_v6  ;;  %418 = vpow2.f32 %v160_v5 }
  0x34   : > { %p462_p3 = pnand %p461_p2, %p455_p12 }
  0x35   : > { %420 = vpow2.f32 %v166_v7 }
  0x40   : > { %v419_v8 = vpop.eup %418 }
  0x42   : > { %v421_v9 = vpop.eup %420 }
  0x43   : > { %v348_v10 = vrot.slane %v421_v9, 9 }
  0x45   : > { %v172_v11 = vadd.f32 %v419_v8, %v348_v10 }
  0x47   : > { %422 = vrcp.f32 %v172_v11 }
  0x54   : > { %v423_v16 = vpop.eup %422 }
  0x55   : > { %v175_v21 = vmul.f32 %v423_v16, %v419_v8  ;;  %v177_v22 = vrot.slane %v423_v16, 7 }
  0x57   : > { %v179_v25 = vmul.f32 %v421_v9, %v177_v22  ;;  %v184_v26 = vrot.slane %v175_v21, %v183_v14  ;;  %v188_v27 = vrot.slane %v175_v21, %v187_v15  ;;  %v205_v28 = vrot.slane %v175_v21, %v204_v19 }
  0x58   : > { %v209_v29 = vrot.slane %v175_v21, %v208_v20 }
  0x59   : > { %v195_v30 = vrot.slane %v179_v25, %v194_v17  ;;  %v199_v31 = vrot.slane %v179_v25, %v198_v18  ;;  %v215_v32 = vrot.slane %v179_v25, %v214_v23  ;;  %v219_v33 = vrot.slane %v179_v25, %v218_v24 }
  0x5b   : > { %v223_v34 = vsel %vm222_vm0, %v184_v26, %v195_v30  ;;  %v224_v35 = vsel %vm222_vm0, %v188_v27, %v199_v31 }
  0x5c   : > { %v226_v36 = vsel %vm225_vm1, %v223_v34, %v205_v28  ;;  %v227_v37 = vsel %vm225_vm1, %v224_v35, %v209_v29 }
  0x5d   : > { %v229_v38 = vsel %vm228_vm2, %v226_v36, %v215_v32  ;;  %v230_v39 = vsel %vm228_vm2, %v227_v37, %v219_v33 }
  0x5e   : > { %v233_v40 = vcombine.low %v229_v38, %v230_v39 }
  0x60   : > { %235 = vst [vmem:[%s150_s18] sm:$0xff] %v233_v40 }
  0x61   : > { %465 = shalt.err (!%p462_p3)
}
  0x62   : > { %s466_s2 = scalar_lea.hbm %s251_s26, 128  ;;  %s470_s5 = scalar_lea.hbm %s685_s1, 256 }
  0x63   : > { %p467_p5 = scmp.ne.s32.totalorder %s251_s26, %s466_s2  ;;  %p471_p10 = scmp.lt.s32.totalorder %s251_s26, %s685_s1 }
  0x64   : > { %p472_p4 = scmp.lt.s32.totalorder %s470_s5, %s466_s2 }
  0x65   : > { %p468_p6 = pnand %p467_p5, %p597_p9 }
  0x66   : > { %p473_p13 = por %p472_p4, %p471_p10 }
  0x67   : > { %p469_p7 = pneg %p468_p6 }
  0x69   : > { %p474_p8 = pnand %p473_p13, %p469_p7 }
  0x6b   : > { %477 = shalt.err (!%p474_p8)
}
  0x6c   : > { %358 = dma.vmem_to_hbm [thread:$0]  (%p597_p9), %s254_s22, 128, %s251_s26, %s237_s27  }
  0x6d PF: > { %s265_s15 = sand.u32 1, %s512_s6   ;;  %p691_p11 = scmp.ne.s32.totalorder %s689_s21, 0 }
  0x6e   : > { %p692_p12 = scmp.ge.s32.totalorder %s532_s11, 2  ;;  %s266_s16 = scalar_lea.sflag [#allocation4], %s265_s15 }
  0x70   : > { %p365_p0 = pnand %p692_p12, %p691_p11 }
  0x72   : > { %p366_p1 = pneg %p365_p0 }
  0x74   : > { %507 = dma.done.wait (%p366_p1), %s266_s16, 128  }
  0x75   : > { %509 = vsyncadd (%p366_p1), %s266_s16, 4294967168  ;;  %s17_s11 = sadd.s32 1, %s532_s11   ;;  %s693_s6 = smov %s516_s7 }
  0x76   : > { %p14_p2 = scmp.ge.s32.totalorder %s17_s11, 4   ;;  %s694_s7 = smov %s520_s8 }
  0x77   : > { %s695_s8 = smov %s602_s20  ;;  %s696_s9 = smov %s528_s10 }
  0x78   : > { %s697_s10 = smov %s699_s14  ;;  %16 = sbr.rel (!%p14_p2) target bundleno = 6 (0x6), region = 69 }
  0x7d   :  { %271 = vsyncpa [#allocation3], 1 }
  0x7e   :  { %273 = vsyncpa [#allocation3 + $0x1], 1 }
  0x7f   :  { %274 = vsyncpa [#allocation4], 1 }
  0x80   :  { %276 = vsyncpa [#allocation4 + $0x1], 1 }

</bundles_post_ra>
